<compile_context>
chip_gen: v6e
topology: v6e:2x2x1
jax: 0.10.0
libtpu: 0.0.40
codegen_flags: <defaults>
</compile_context>

<pallas_src>
import functools

import jax
import jax.numpy as jnp
from jax import lax
from jax.experimental import pallas as pl
from jax.experimental.pallas import tpu as pltpu

EPS = 1e-5


def _softplus(h):
    # Stable softplus with exactly one exp + one log on the EUP.
    # TODO(synk): jnp.log1p would be marginally more accurate near 0.
    return jnp.maximum(h, 0.0) + jnp.log(1.0 + jnp.exp(-jnp.abs(h)))


def _vmem_budget():
    """(tile budget bytes, vmem_limit_bytes), derived from the actual chip."""
    phys = 64 * 1024 * 1024  # conservative default (v7x physical VMEM)
    try:
        info = pltpu.get_tpu_info()
        phys = int(getattr(info, "vmem_capacity_bytes", phys))
    except Exception:
        pass
    vmem_limit = min(phys // 2, 96 * 1024 * 1024)   # 64 MiB on v5e/v6e, 32 MiB on v7x
    tile_budget = (2 * vmem_limit) // 3
    return tile_budget, vmem_limit


# --------------------------------------------------------------------------
# Fused single-block kernel (tiny problems only: whole problem resident in VMEM).
# --------------------------------------------------------------------------
def _mlp_fused_kernel(x_ref, w1_ref, g1_ref, be1_ref, w2_ref, g2_ref, be2_ref,
                      o_ref, *, matmul_dtype):
    inv_b = 1.0 / x_ref.shape[0]

    # Linear 1 (MXU).  Bias omitted: cancelled by BN mean subtraction.
    h = jnp.dot(x_ref[...].astype(matmul_dtype), w1_ref[...].astype(matmul_dtype),
                preferred_element_type=jnp.float32)

    # BatchNorm1d(hidden): center once, fold gamma into the rsqrt scale.
    mean1 = jnp.sum(h, axis=0, keepdims=True) * inv_b
    c1 = h - mean1
    var1 = jnp.sum(c1 * c1, axis=0, keepdims=True) * inv_b      # biased variance
    hn = c1 * (g1_ref[...] * lax.rsqrt(var1 + EPS)) + be1_ref[...]

    # Softplus (f32 on VPU/EUP — v5e has no bf16 VPU, keep activations f32).
    a = _softplus(hn)

    # Linear 2 (MXU).
    y = jnp.dot(a.astype(matmul_dtype), w2_ref[...].astype(matmul_dtype),
                preferred_element_type=jnp.float32)

    # BatchNorm1d(out) + Tanh.
    mean2 = jnp.sum(y, axis=0, keepdims=True) * inv_b
    c2 = y - mean2
    var2 = jnp.sum(c2 * c2, axis=0, keepdims=True) * inv_b
    o_ref[...] = jnp.tanh(
        c2 * (g2_ref[...] * lax.rsqrt(var2 + EPS)) + be2_ref[...]
    ).astype(o_ref.dtype)


def mlp_block_fused(x, w1, g1, be1, w2, g2, be2, *, matmul_dtype=jnp.float32):
    B = x.shape[0]
    out_size = w2.shape[1]
    _, vmem_lim = _vmem_budget()
    vmem = pl.BlockSpec(memory_space=pltpu.MemorySpace.VMEM)
    return pl.pallas_call(
        functools.partial(_mlp_fused_kernel, matmul_dtype=matmul_dtype),
        out_shape=jax.ShapeDtypeStruct((B, out_size), jnp.float32),
        in_specs=[vmem] * 7,
        out_specs=vmem,
        compiler_params=pltpu.CompilerParams(vmem_limit_bytes=vmem_lim),
    )(x, w1, g1, be1, w2, g2, be2)


# --------------------------------------------------------------------------
# Lane-packed 3-stage streaming path (large B, in_size <= 128).
#
# Packed layout: P = 128 // in_pad samples per 128-lane row.
#   x_pk[r, j*in_pad + k]  = x[r*P + j, k]
#   W1_big = kron(I_P, W1) : (128, P*H)   (block diagonal)
#   W2_big = kron(I_P, W2) : (P*H, P*OUT)
# so every matmul / load / store is lane-dense and per-sample semantics are
# preserved exactly.  h / y are never written to HBM (recomputed per stage).
# --------------------------------------------------------------------------
def _packed_stage1_kernel(x_ref, w1_ref, s_ref, q_ref, *, matmul_dtype):
    # h = x @ W1_big ; emit per-tile partial sum / sum-of-squares (8, P*H).
    h = jnp.dot(x_ref[...].astype(matmul_dtype), w1_ref[...],
                preferred_element_type=jnp.float32)
    hr = h.reshape(h.shape[0] // 8, 8, h.shape[1])
    s_ref[...] = jnp.sum(hr, axis=0)
    q_ref[...] = jnp.sum(hr * hr, axis=0)


def _packed_stage2_kernel(x_ref, w1_ref, sc1_ref, sh1_ref, w2_ref, s_ref, q_ref, *,
                          matmul_dtype, rows_per_tile, pack, out_f, batch,
                          needs_mask):
    # Recompute h, apply BN1 (precomputed scale/shift), softplus, Linear2;
    # emit per-tile partial BN2 statistics.  y is NOT written to HBM.
    h = jnp.dot(x_ref[...].astype(matmul_dtype), w1_ref[...],
                preferred_element_type=jnp.float32)
    a = _softplus(h * sc1_ref[...] + sh1_ref[...])
    y = jnp.dot(a.astype(matmul_dtype), w2_ref[...],
                preferred_element_type=jnp.float32)
    if needs_mask:
        # Zero contributions from batch-padding samples (exact BN2 statistics).
        row = (pl.program_id(0) * rows_per_tile
               + lax.broadcasted_iota(jnp.int32, y.shape, 0))
        lane = lax.broadcasted_iota(jnp.int32, y.shape, 1)
        valid = (row * pack + lane // out_f) < batch
        y = jnp.where(valid, y, 0.0)
    yr = y.reshape(y.shape[0] // 8, 8, y.shape[1])
    s_ref[...] = jnp.sum(yr, axis=0)
    q_ref[...] = jnp.sum(yr * yr, axis=0)


def _packed_stage3_kernel(x_ref, w1_ref, sc1_ref, sh1_ref, w2_ref, sc2_ref,
                          sh2_ref, o_ref, *, matmul_dtype):
    # Recompute everything and write the final lane-dense output tile.
    h = jnp.dot(x_ref[...].astype(matmul_dtype), w1_ref[...],
                preferred_element_type=jnp.float32)
    a = _softplus(h * sc1_ref[...] + sh1_ref[...])
    y = jnp.dot(a.astype(matmul_dtype), w2_ref[...],
                preferred_element_type=jnp.float32)
    o_ref[...] = jnp.tanh(y * sc2_ref[...] + sh2_ref[...]).astype(o_ref.dtype)


def _pick_rows_per_tile(r_need, pw_in, pw_h, pw_out, budget_bytes):
    # Streamed (double-buffered) x/out tiles plus f32 in-kernel intermediates
    # (h, a, y) all scale with the packed-row count of the tile.
    per_row = 4 * (2 * pw_in + 2 * pw_out + 3 * pw_h + 2 * pw_out)
    resident = 4 * (pw_in * pw_h + pw_h * pw_out) + 64 * 1024
    avail = max(budget_bytes - resident, 256 * 1024)
    tb = avail // per_row
    tb = min(tb, 8192, -(-r_need // 8) * 8)   # no need to exceed what exists
    return max(8, (tb // 8) * 8)


def mlp_block_packed(x, w1, g1, be1, w2, g2, be2, *, matmul_dtype=jnp.float32,
                     rows_per_tile=None):
    B, IN = x.shape
    H = w1.shape[1]
    OUT = w2.shape[1]
    assert IN <= 128, "packed path requires in_size <= 128"

    # Packing factor: P samples per 128-lane row (pad features to a divisor of 128).
    in_pad = 1
    while in_pad < IN:
        in_pad *= 2
    P = 128 // in_pad
    PW_IN, PW_H, PW_OUT = P * in_pad, P * H, P * OUT      # PW_IN == 128

    tile_budget, vmem_lim = _vmem_budget()
    r_need = -(-B // P)
    if rows_per_tile is None:
        rows_per_tile = _pick_rows_per_tile(r_need, PW_IN, PW_H, PW_OUT, tile_budget)
    tb = max(8, (rows_per_tile // 8) * 8)
    nb = -(-r_need // tb)
    r_pad = nb * tb
    b_pad = r_pad * P
    needs_mask = b_pad != B

    # Pad (zeros) and pack the input; zero rows contribute 0 to BN1 stats since
    # the linear bias is dropped, and BN2 stats are masked in-kernel.
    xp = x
    if b_pad != B or in_pad != IN:
        xp = jnp.pad(x, ((0, b_pad - B), (0, in_pad - IN)))
    x_pk = xp.reshape(r_pad, PW_IN)

    # Block-diagonal weights (built once, pre-cast to matmul_dtype per feedback).
    eye_p = jnp.eye(P, dtype=jnp.float32)
    w1p = w1 if in_pad == IN else jnp.pad(w1, ((0, in_pad - IN), (0, 0)))
    w1_big = jnp.kron(eye_p, w1p).astype(matmul_dtype)       # (128, P*H)
    w2_big = jnp.kron(eye_p, w2).astype(matmul_dtype)        # (P*H, P*OUT)

    cp_par = pltpu.CompilerParams(dimension_semantics=("parallel",),
                                  vmem_limit_bytes=vmem_lim)

    # ---- Stage 1: Linear1 -> partial BN1 statistics (fully parallel grid). ----
    s1p, q1p = pl.pallas_call(
        functools.partial(_packed_stage1_kernel, matmul_dtype=matmul_dtype),
        grid=(nb,),
        in_specs=[
            pl.BlockSpec((tb, PW_IN), lambda i: (i, 0)),
            pl.BlockSpec((PW_IN, PW_H), lambda i: (0, 0)),
        ],
        out_specs=[
            pl.BlockSpec((8, PW_H), lambda i: (i, 0)),
            pl.BlockSpec((8, PW_H), lambda i: (i, 0)),
        ],
        out_shape=[
            jax.ShapeDtypeStruct((nb * 8, PW_H), jnp.float32),
            jax.ShapeDtypeStruct((nb * 8, PW_H), jnp.float32),
        ],
        compiler_params=cp_par,
    )(x_pk, w1_big)

    s1 = s1p.reshape(nb * 8, P, H).sum(axis=(0, 1))
    q1 = q1p.reshape(nb * 8, P, H).sum(axis=(0, 1))
    mean1 = s1 / B
    var1 = jnp.maximum(q1 / B - mean1 * mean1, 0.0)   # biased batch variance
    scale1 = (g1.reshape(-1) * lax.rsqrt(var1 + EPS)).reshape(1, H)
    shift1 = be1.reshape(1, H) - mean1.reshape(1, H) * scale1
    scale1_big = jnp.tile(scale1, (1, P))             # (1, P*H), lane-replicated
    shift1_big = jnp.tile(shift1, (1, P))

    # ---- Stage 2: recompute h -> BN1 -> softplus -> Linear2 -> partial BN2 stats.
    s2p, q2p = pl.pallas_call(
        functools.partial(_packed_stage2_kernel, matmul_dtype=matmul_dtype,
                          rows_per_tile=tb, pack=P, out_f=OUT, batch=B,
                          needs_mask=needs_mask),
        grid=(nb,),
        in_specs=[
            pl.BlockSpec((tb, PW_IN), lambda i: (i, 0)),
            pl.BlockSpec((PW_IN, PW_H), lambda i: (0, 0)),
            pl.BlockSpec((1, PW_H), lambda i: (0, 0)),
            pl.BlockSpec((1, PW_H), lambda i: (0, 0)),
            pl.BlockSpec((PW_H, PW_OUT), lambda i: (0, 0)),
        ],
        out_specs=[
            pl.BlockSpec((8, PW_OUT), lambda i: (i, 0)),
            pl.BlockSpec((8, PW_OUT), lambda i: (i, 0)),
        ],
        out_shape=[
            jax.ShapeDtypeStruct((nb * 8, PW_OUT), jnp.float32),
            jax.ShapeDtypeStruct((nb * 8, PW_OUT), jnp.float32),
        ],
        compiler_params=cp_par,
    )(x_pk, w1_big, scale1_big, shift1_big, w2_big)

    s2 = s2p.reshape(nb * 8, P, OUT).sum(axis=(0, 1))
    q2 = q2p.reshape(nb * 8, P, OUT).sum(axis=(0, 1))
    mean2 = s2 / B
    var2 = jnp.maximum(q2 / B - mean2 * mean2, 0.0)
    scale2 = (g2.reshape(-1) * lax.rsqrt(var2 + EPS)).reshape(1, OUT)
    shift2 = be2.reshape(1, OUT) - mean2.reshape(1, OUT) * scale2
    scale2_big = jnp.tile(scale2, (1, P))
    shift2_big = jnp.tile(shift2, (1, P))

    # ---- Stage 3: recompute + BN2 + tanh, lane-dense output store. ----
    out_pk = pl.pallas_call(
        functools.partial(_packed_stage3_kernel, matmul_dtype=matmul_dtype),
        grid=(nb,),
        in_specs=[
            pl.BlockSpec((tb, PW_IN), lambda i: (i, 0)),
            pl.BlockSpec((PW_IN, PW_H), lambda i: (0, 0)),
            pl.BlockSpec((1, PW_H), lambda i: (0, 0)),
            pl.BlockSpec((1, PW_H), lambda i: (0, 0)),
            pl.BlockSpec((PW_H, PW_OUT), lambda i: (0, 0)),
            pl.BlockSpec((1, PW_OUT), lambda i: (0, 0)),
            pl.BlockSpec((1, PW_OUT), lambda i: (0, 0)),
        ],
        out_specs=pl.BlockSpec((tb, PW_OUT), lambda i: (i, 0)),
        out_shape=jax.ShapeDtypeStruct((r_pad, PW_OUT), jnp.float32),
        compiler_params=cp_par,
    )(x_pk, w1_big, scale1_big, shift1_big, w2_big, scale2_big, shift2_big)

    return out_pk.reshape(b_pad, OUT)[:B]


# --------------------------------------------------------------------------
# Dispatcher.  b1 / b2 accepted for API parity with the PyTorch module but are
# mathematically cancelled by training-mode BatchNorm.
# --------------------------------------------------------------------------
def mlp_block(x, w1, b1, g1, be1, w2, b2, g2, be2, *, matmul_dtype=jnp.float32,
              force_packed=False):
    del b1, b2  # exactly cancelled by BN mean subtraction (training mode)
    B, IN = x.shape
    H = w1.shape[1]
    OUT = w2.shape[1]
    fused_bytes = 4 * (B * (IN + 2 * H + 2 * OUT) + IN * H + H * OUT + 4 * (H + OUT))
    # Tiny problems: single fused block (a multi-call pipeline is pure launch
    # overhead).  Threshold <= 4 MiB keeps it safe under v5e's 16 MiB scoped VMEM.
    if not force_packed and (fused_bytes <= 4 * 1024 * 1024 or IN > 128):
        return mlp_block_fused(x, w1, g1, be1, w2, g2, be2,
                               matmul_dtype=matmul_dtype)
    return mlp_block_packed(x, w1, g1, be1, w2, g2, be2, matmul_dtype=matmul_dtype)


# --------------------------------------------------------------------------
# Pure-JAX reference (keeps the biases, exactly like the PyTorch module).
# --------------------------------------------------------------------------
def _reference(x, w1, b1, g1, be1, w2, b2, g2, be2):
    h = x @ w1 + b1
    m = h.mean(0, keepdims=True)
    v = ((h - m) ** 2).mean(0, keepdims=True)
    h = (h - m) / jnp.sqrt(v + EPS) * g1 + be1
    h = jnp.logaddexp(h, 0.0)
    y = h @ w2 + b2
    m = y.mean(0, keepdims=True)
    v = ((y - m) ** 2).mean(0, keepdims=True)
    y = (y - m) / jnp.sqrt(v + EPS) * g2 + be2
    return jnp.tanh(y)


if __name__ == "__main__":
    IN, HID, OUT = 16, 32, 16
    key = jax.random.PRNGKey(0)
    k = jax.random.split(key, 7)

    bound1 = 1.0 / jnp.sqrt(IN)
    w1 = jax.random.uniform(k[1], (IN, HID), minval=-bound1, maxval=bound1, dtype=jnp.float32)
    b1 = jax.random.uniform(k[2], (1, HID), minval=-bound1, maxval=bound1, dtype=jnp.float32)
    bound2 = 1.0 / jnp.sqrt(HID)
    w2 = jax.random.uniform(k[3], (HID, OUT), minval=-bound2, maxval=bound2, dtype=jnp.float32)
    b2 = jax.random.uniform(k[4], (1, OUT), minval=-bound2, maxval=bound2, dtype=jnp.float32)
    g1 = jnp.ones((1, HID), jnp.float32)
    be1 = jnp.zeros((1, HID), jnp.float32)
    g2 = jnp.ones((1, OUT), jnp.float32)
    be2 = jnp.zeros((1, OUT), jnp.float32)

    # --- small shape: fused single-block path (f32 MXU, exact) ---
    B = 8
    x = jax.random.normal(k[0], (B, IN), dtype=jnp.float32)
    out = jax.block_until_ready(mlp_block(x, w1, b1, g1, be1, w2, b2, g2, be2))
    ref = _reference(x, w1, b1, g1, be1, w2, b2, g2, be2)
    assert out.shape == (B, OUT)
    assert jnp.allclose(out, ref, atol=1e-4, rtol=1e-4), "fused f32 mismatch"

    # --- bf16 MXU operands (f32 accumulation / f32 BN + activations) ---
    out_bf16 = jax.block_until_ready(
        mlp_block(x, w1, b1, g1, be1, w2, b2, g2, be2, matmul_dtype=jnp.bfloat16))
    assert jnp.allclose(out_bf16, ref, atol=5e-2), "fused bf16 mismatch"

    # --- larger batch: lane-packed 3-stage streaming path (4 tiles, no padding) ---
    B2 = 512
    x2 = jax.random.normal(k[5], (B2, IN), dtype=jnp.float32)
    out2 = jax.block_until_ready(
        mlp_block_packed(x2, w1, g1, be1, w2, g2, be2, rows_per_tile=16))
    ref2 = _reference(x2, w1, b1, g1, be1, w2, b2, g2, be2)
    assert out2.shape == (B2, OUT)
    assert jnp.allclose(out2, ref2, atol=1e-4, rtol=1e-4), "packed path mismatch"

    # --- awkward batch (not a multiple of 8): zero padding + in-kernel stat mask ---
    B3 = 509
    x3 = jax.random.normal(k[6], (B3, IN), dtype=jnp.float32)
    out3 = jax.block_until_ready(
        mlp_block_packed(x3, w1, g1, be1, w2, g2, be2, rows_per_tile=16))
    ref3 = _reference(x3, w1, b1, g1, be1, w2, b2, g2, be2)
    assert out3.shape == (B3, OUT)
    assert jnp.allclose(out3, ref3, atol=1e-4, rtol=1e-4), "padded/masked path mismatch"

    print("KERNEL_OK")
</pallas_src>

<mosaic_0001>
module attributes {stable_mosaic.version = 11 : i64} {
  func.func @_mlp_fused_kernel(%arg0: memref<8x16xf32, #tpu.memory_space<vmem>>, %arg1: memref<16x32xf32, #tpu.memory_space<vmem>>, %arg2: memref<1x32xf32, #tpu.memory_space<vmem>>, %arg3: memref<1x32xf32, #tpu.memory_space<vmem>>, %arg4: memref<32x16xf32, #tpu.memory_space<vmem>>, %arg5: memref<1x16xf32, #tpu.memory_space<vmem>>, %arg6: memref<1x16xf32, #tpu.memory_space<vmem>>, %arg7: memref<8x16xf32, #tpu.memory_space<vmem>>) attributes {dimension_semantics = [], scalar_prefetch = 0 : i64, scratch_operands = 0 : i64, tpu.core_type = #tpu.core_type<tc>} {
    %c0 = arith.constant 0 : index
    %c0_0 = arith.constant 0 : index
    %0 = vector.load %arg0[%c0, %c0_0] : memref<8x16xf32, #tpu.memory_space<vmem>>, vector<8x16xf32>
    %c0_1 = arith.constant 0 : index
    %c0_2 = arith.constant 0 : index
    %1 = vector.load %arg1[%c0_1, %c0_2] : memref<16x32xf32, #tpu.memory_space<vmem>>, vector<16x32xf32>
    %cst = arith.constant dense<0.000000e+00> : vector<8x32xf32>
    %2 = tpu.matmul %0, %1, %cst {dimension_numbers = #tpu.dot_dimension_numbers<[1], [0], [0], [1], [0, 0, 1, 1], [], []>} : vector<8x16xf32>, vector<16x32xf32>, vector<8x32xf32> -> vector<8x32xf32>
    %cst_3 = arith.constant dense<0.000000e+00> : vector<32xf32>
    %3 = vector.multi_reduction <add>, %2, %cst_3 [0] : vector<8x32xf32> to vector<32xf32>
    %4 = vector.shape_cast %3 : vector<32xf32> to vector<1x32xf32>
    %cst_4 = arith.constant 1.250000e-01 : f32
    %5 = vector.broadcast %cst_4 : f32 to vector<1x32xf32>
    %6 = arith.mulf %4, %5 : vector<1x32xf32>
    %7 = vector.broadcast %6 : vector<1x32xf32> to vector<8x32xf32>
    %8 = arith.subf %2, %7 : vector<8x32xf32>
    %9 = arith.mulf %8, %8 : vector<8x32xf32>
    %cst_5 = arith.constant dense<0.000000e+00> : vector<32xf32>
    %10 = vector.multi_reduction <add>, %9, %cst_5 [0] : vector<8x32xf32> to vector<32xf32>
    %11 = vector.shape_cast %10 : vector<32xf32> to vector<1x32xf32>
    %cst_6 = arith.constant 1.250000e-01 : f32
    %12 = vector.broadcast %cst_6 : f32 to vector<1x32xf32>
    %13 = arith.mulf %11, %12 : vector<1x32xf32>
    %c0_7 = arith.constant 0 : index
    %c0_8 = arith.constant 0 : index
    %14 = vector.load %arg2[%c0_7, %c0_8] : memref<1x32xf32, #tpu.memory_space<vmem>>, vector<1x32xf32>
    %cst_9 = arith.constant 9.99999974E-6 : f32
    %15 = vector.broadcast %cst_9 : f32 to vector<1x32xf32>
    %16 = arith.addf %13, %15 : vector<1x32xf32>
    %17 = math.rsqrt %16 : vector<1x32xf32>
    %18 = arith.mulf %14, %17 : vector<1x32xf32>
    %19 = vector.broadcast %18 : vector<1x32xf32> to vector<8x32xf32>
    %20 = arith.mulf %8, %19 : vector<8x32xf32>
    %c0_10 = arith.constant 0 : index
    %c0_11 = arith.constant 0 : index
    %21 = vector.load %arg3[%c0_10, %c0_11] : memref<1x32xf32, #tpu.memory_space<vmem>>, vector<1x32xf32>
    %22 = vector.broadcast %21 : vector<1x32xf32> to vector<8x32xf32>
    %23 = arith.addf %20, %22 : vector<8x32xf32>
    %cst_12 = arith.constant 0.000000e+00 : f32
    %24 = vector.broadcast %cst_12 : f32 to vector<8x32xf32>
    %25 = arith.maximumf %23, %24 : vector<8x32xf32>
    %26 = math.absf %23 : vector<8x32xf32>
    %cst_13 = arith.constant 0.000000e+00 : f32
    %27 = vector.broadcast %cst_13 : f32 to vector<8x32xf32>
    %28 = arith.subf %27, %26 : vector<8x32xf32>
    %29 = math.exp %28 : vector<8x32xf32>
    %cst_14 = arith.constant 1.000000e+00 : f32
    %30 = vector.broadcast %cst_14 : f32 to vector<8x32xf32>
    %31 = arith.addf %30, %29 : vector<8x32xf32>
    %32 = math.log %31 : vector<8x32xf32>
    %33 = arith.addf %25, %32 : vector<8x32xf32>
    %c0_15 = arith.constant 0 : index
    %c0_16 = arith.constant 0 : index
    %34 = vector.load %arg4[%c0_15, %c0_16] : memref<32x16xf32, #tpu.memory_space<vmem>>, vector<32x16xf32>
    %cst_17 = arith.constant dense<0.000000e+00> : vector<8x16xf32>
    %35 = tpu.matmul %33, %34, %cst_17 {dimension_numbers = #tpu.dot_dimension_numbers<[1], [0], [0], [1], [0, 0, 1, 1], [], []>} : vector<8x32xf32>, vector<32x16xf32>, vector<8x16xf32> -> vector<8x16xf32>
    %cst_18 = arith.constant dense<0.000000e+00> : vector<16xf32>
    %36 = vector.multi_reduction <add>, %35, %cst_18 [0] : vector<8x16xf32> to vector<16xf32>
    %37 = vector.shape_cast %36 : vector<16xf32> to vector<1x16xf32>
    %cst_19 = arith.constant 1.250000e-01 : f32
    %38 = vector.broadcast %cst_19 : f32 to vector<1x16xf32>
    %39 = arith.mulf %37, %38 : vector<1x16xf32>
    %40 = vector.broadcast %39 : vector<1x16xf32> to vector<8x16xf32>
    %41 = arith.subf %35, %40 : vector<8x16xf32>
    %42 = arith.mulf %41, %41 : vector<8x16xf32>
    %cst_20 = arith.constant dense<0.000000e+00> : vector<16xf32>
    %43 = vector.multi_reduction <add>, %42, %cst_20 [0] : vector<8x16xf32> to vector<16xf32>
    %44 = vector.shape_cast %43 : vector<16xf32> to vector<1x16xf32>
    %cst_21 = arith.constant 1.250000e-01 : f32
    %45 = vector.broadcast %cst_21 : f32 to vector<1x16xf32>
    %46 = arith.mulf %44, %45 : vector<1x16xf32>
    %c0_22 = arith.constant 0 : index
    %c0_23 = arith.constant 0 : index
    %47 = vector.load %arg5[%c0_22, %c0_23] : memref<1x16xf32, #tpu.memory_space<vmem>>, vector<1x16xf32>
    %cst_24 = arith.constant 9.99999974E-6 : f32
    %48 = vector.broadcast %cst_24 : f32 to vector<1x16xf32>
    %49 = arith.addf %46, %48 : vector<1x16xf32>
    %50 = math.rsqrt %49 : vector<1x16xf32>
    %51 = arith.mulf %47, %50 : vector<1x16xf32>
    %52 = vector.broadcast %51 : vector<1x16xf32> to vector<8x16xf32>
    %53 = arith.mulf %41, %52 : vector<8x16xf32>
    %c0_25 = arith.constant 0 : index
    %c0_26 = arith.constant 0 : index
    %54 = vector.load %arg6[%c0_25, %c0_26] : memref<1x16xf32, #tpu.memory_space<vmem>>, vector<1x16xf32>
    %55 = vector.broadcast %54 : vector<1x16xf32> to vector<8x16xf32>
    %56 = arith.addf %53, %55 : vector<8x16xf32>
    %57 = math.tanh %56 : vector<8x16xf32>
    %c0_27 = arith.constant 0 : index
    %c0_28 = arith.constant 0 : index
    %58 = vector.load %arg7[%c0_27, %c0_28] : memref<8x16xf32, #tpu.memory_space<vmem>>, vector<8x16xf32>
    tpu.vector_store %arg7[%c0_27, %c0_28], %57 {strides = array<i32>} : memref<8x16xf32, #tpu.memory_space<vmem>>, vector<8x16xf32>,
    return
  }
}

</mosaic_0001>

<bundles_post_ra>
// kernel: tpu_custom_call.1
= control target key start
LH: loop header
LB: loop body
LE: loop exit
PB: predicated region body
PF: predicated region fallthrough
CT: control target
= control target key end

     0   :  { %v346_v1 = vmov 0.0   ;;  %vm347_vm0 = vmmov 0   ;;  %s432_s0 = inlined_call_operand.vmem [shape: f32[8,16], index: 0, kind: input, shape index: {}]   ;;  %s433_s1 = inlined_call_operand.vmem [shape: f32[16,32], index: 1, kind: input, shape index: {}]   ;;  %s434_s2 = inlined_call_operand.vmem [shape: f32[1,32], index: 2, kind: input, shape index: {}]   ;;  %s435_s3 = inlined_call_operand.vmem [shape: f32[1,32], index: 3, kind: input, shape index: {}]   ;;  %s436_s4 = inlined_call_operand.vmem [shape: f32[32,16], index: 4, kind: input, shape index: {}]   ;;  %s437_s5 = inlined_call_operand.vmem [shape: f32[1,16], index: 5, kind: input, shape index: {}]   ;;  %s438_s6 = inlined_call_operand.vmem [shape: f32[1,16], index: 6, kind: input, shape index: {}]   ;;  %s439_s7 = inlined_call_operand.hbm [shape: f32[8,16], index: 7, kind: output, shape index: {}]  }
   0x1   :  { %v29_v0 = vld [vmem:[%s433_s1 + $0x8] sm:$0xff]  ;;  %293 = vmatprep.subr.mxu0 %v346_v1  ;;  %v28_v2 = vld [vmem:[%s433_s1] sm:$0xff]  ;;  %297 = vmatprep.mubr.msk.f32.mxu0 %vm347_vm0, %v346_v1 }
   0x2   :  { %12 = vsyncpa [#allocation3], 0  ;;  %294 = vmatpush3.msra.mxu0 %v29_v0  ;;  %v27_v3 = vld [vmem:[%s432_s0] sm:$0xff]  ;;  %vm30_vm1 = vcmask 130048   ;;  %300 = vmatprep.subr.mxu1 %v346_v1  ;;  %v154_v4 = vld [vmem:[%s436_s4 + $0x18] sm:$0xff]  ;;  %vm104_vm2 = vcmask 261120   ;;  %v128_v29 = vlaneseq }
   0x3   :  { %295 = vmatprep.subr.mxu0 %v346_v1  ;;  %308 = vmatprep.mubr.msk.f32.mxu1 %vm347_vm0, %v346_v1  ;;  %v153_v5 = vld [vmem:[%s436_s4 + $0x10] sm:$0xff]  ;;  %v152_v6 = vld [vmem:[%s436_s4 + $0x8] sm:$0xff]  ;;  %v151_v7 = vld [vmem:[%s436_s4] sm:$0xff]  ;;  %s348_s18 = smov [#allocation2]  }
   0x4   :  { %296 = vmatpush3.msra.mxu0 %v28_v2  ;;  %301 = vmatpush3.msra.mxu1 %v154_v4  ;;  %v129_v30 = vshrl.u32 %v128_v29, 7  ;;  %v123_v31 = vld [vmem:[%s434_s2] sm:$0x1]  ;;  %s273_s19 = sshll.u32 %s348_s18, 4  ;;  %s274_s19 = int_to_ptr.vmem [resolvable:$true] %s273_s19 }
   0x5   :  { %298 = vmatmul.mubr.msk.f32.vlgmr.msra.gmra.mxu0 %vm30_vm1, %v27_v3  ;;  %302 = vmatprep.subr.mxu1 %v346_v1  ;;  %v282_v36 = vld [vmem:[%s435_s3] ss:$0 sm:$0xff]  ;;  %s324_s20 = scalar_lea.vmem %s274_s19, 128  ;;  %p329_p1 = scmp.lt.s32.totalorder %s274_s19, %s274_s19 }
   0x6   :  { %303 = vmatpush3.msra.mxu1 %v153_v5  ;;  %v130_v32 = vsub.s32 0, %v129_v30  ;;  %v246_v5 = vld [vmem:[%s437_s5] sm:$0x1]  ;;  %p325_p0 = scmp.ne.s32.totalorder %s274_s19, %s324_s20  ;;  %p330_p2 = scmp.lt.s32.totalorder %s324_s20, %s324_s20 }
   0x7   :  { %304 = vmatprep.subr.mxu1 %v346_v1 }
   0x8   :  { %305 = vmatpush3.msra.mxu1 %v152_v6  ;;  %p331_p3 = por %p330_p2, %p329_p1 }
   0x9   :  { %306 = vmatprep.subr.mxu1 %v346_v1 }
   0xa   :  { %307 = vmatpush3.msra.mxu1 %v151_v7  ;;  %p332_p4 = pnand %p331_p3, %p325_p0 }
  0xc5   :  { %v100_v8 = vpop.f32.mrf.mxu0 }
  0xc6   :  { %v105_v9 = vsel %vm104_vm2, %v100_v8, 0.0 }
  0xc7   :  { %v106_v10 = vrot.slane %v105_v9, 4  ;;  %v299_v11 = vpop.f32.mrf.mxu0 }
  0xc9   :  { %v107_v12 = vadd.f32 %v106_v10, %v105_v9  ;;  %v284_v9 = vld [vmem:[%s438_s6] ss:$0 sm:$0xff] }
  0xcb   :  { %v108_v13 = vrot.slane %v107_v12, 2 }
  0xcd   :  { %v109_v14 = vadd.f32 %v108_v13, %v107_v12 }
  0xcf   :  { %v110_v15 = vrot.slane %v109_v14, 1 }
  0xd1   :  { %v111_v16 = vadd.f32 %v110_v15, %v109_v14 }
  0xd3   :  { %v112_v17 = vmul.f32 0.125, %v111_v16 }
  0xd5   :  { %v113_v18 = vsub.f32 %v100_v8, %v112_v17 }
  0xd7   :  { %v114_v19 = vmul.f32 %v113_v18, %v113_v18 }
  0xd9   :  { %v115_v20 = vsel %vm104_vm2, %v114_v19, 0.0 }
  0xda   :  { %v116_v21 = vrot.slane %v115_v20, 4 }
  0xdc   :  { %v117_v22 = vadd.f32 %v116_v21, %v115_v20 }
  0xde   :  { %v118_v23 = vrot.slane %v117_v22, 2 }
  0xe0   :  { %v119_v24 = vadd.f32 %v118_v23, %v117_v22 }
  0xe2   :  { %v120_v25 = vrot.slane %v119_v24, 1 }
  0xe4   :  { %v121_v26 = vadd.f32 %v120_v25, %v119_v24 }
  0xe6   :  { %v122_v27 = vmul.f32 0.125, %v121_v26 }
  0xe8   :  { %v124_v28 = vadd.f32 1e-05, %v122_v27 }
  0xea   :  { %314 = vrsqrt.f32 %v124_v28 }
  0xf7   :  { %v315_v33 = vpop.eup %314 }
  0xf8   :  { %v126_v34 = vmul.f32 %v315_v33, %v123_v31 }
  0xfa   :  { %v131_v35 = vrot.slane %v126_v34, %v130_v32 }
  0xfc   :  { %v133_v37 = vmul.f32 %v131_v35, %v113_v18 }
  0xfe   :  { %v141_v38 = vadd.f32 %v282_v36, %v133_v37 }
 0x100   :  { %v143_v39 = vand.u32 2147483647, %v141_v38  ;;  %v142_v45 = vmax.f32 %v141_v38, 0.0 }
 0x102   :  { %v144_v40 = vsub.f32 0.0, %v143_v39 }
 0x104   :  { %v145_v41 = vmul.f32 1.442695, %v144_v40 }
 0x106   :  { %316 = vpow2.f32 %v145_v41 }
 0x113   :  { %v317_v42 = vpop.eup %316 }
 0x114   :  { %v147_v43 = vadd.f32 1.0, %v317_v42 }
 0x116   :  { %318 = vlog2.f32 %v147_v43 }
 0x123   :  { %v319_v44 = vpop.eup %318 }
 0x124   :  { %v149_v46 = vmul.f32 0.6931472, %v319_v44 }
 0x126   :  { %v150_v47 = vadd.f32 %v149_v46, %v142_v45 }
 0x128   :  { %309 = vmatmul.mubr.msk.f32.vlgmr.msra.gmra.mxu1 %vm104_vm2, %v150_v47 }
 0x1e8   :  { %v224_v48 = vpop.f32.mrf.mxu1 }
 0x1e9   :  { %v228_v49 = vsel %vm30_vm1, %v224_v48, 0.0 }
 0x1ea   :  { %v229_v50 = vrot.slane %v228_v49, 4  ;;  %v310_v51 = vpop.f32.mrf.mxu1 }
 0x1ec   :  { %v230_v52 = vadd.f32 %v229_v50, %v228_v49 }
 0x1ee   :  { %v231_v53 = vrot.slane %v230_v52, 2 }
 0x1f0   :  { %v232_v54 = vadd.f32 %v231_v53, %v230_v52 }
 0x1f2   :  { %v233_v55 = vrot.slane %v232_v54, 1 }
 0x1f4   :  { %v234_v56 = vadd.f32 %v233_v55, %v232_v54 }
 0x1f6   :  { %v235_v57 = vmul.f32 0.125, %v234_v56 }
 0x1f8   :  { %v236_v58 = vsub.f32 %v224_v48, %v235_v57 }
 0x1fa   :  { %v237_v59 = vmul.f32 %v236_v58, %v236_v58 }
 0x1fc   :  { %v238_v60 = vsel %vm30_vm1, %v237_v59, 0.0 }
 0x1fd   :  { %v239_v61 = vrot.slane %v238_v60, 4 }
 0x1ff   :  { %v240_v62 = vadd.f32 %v239_v61, %v238_v60 }
 0x201   :  { %v241_v63 = vrot.slane %v240_v62, 2 }
 0x203   :  { %v242_v0 = vadd.f32 %v241_v63, %v240_v62 }
 0x205   :  { %v243_v1 = vrot.slane %v242_v0, 1 }
 0x207   :  { %v244_v2 = vadd.f32 %v243_v1, %v242_v0 }
 0x209   :  { %v245_v3 = vmul.f32 0.125, %v244_v2 }
 0x20b   :  { %v247_v4 = vadd.f32 1e-05, %v245_v3 }
 0x20d   :  { %320 = vrsqrt.f32 %v247_v4 }
 0x21a   :  { %v321_v6 = vpop.eup %320 }
 0x21b   :  { %v249_v7 = vmul.f32 %v321_v6, %v246_v5 }
 0x21d   :  { %v254_v8 = vrot.slane %v249_v7, %v130_v32 }
 0x21f   :  { %v256_v10 = vmul.f32 %v254_v8, %v236_v58 }
 0x221   :  { %v264_v11 = vadd.f32 %v284_v9, %v256_v10 }
 0x223   :  { %322 = vtanh.f32 %v264_v11 }
 0x230   :  { %v323_v12 = vpop.eup %322 }
 0x231   :  { %266 = vst.msk [vmem:[#allocation2] sm:$0xff] %vm30_vm1, %v323_v12 }
 0x232   :  { %335 = shalt.err (!%p332_p4)
}
 0x233   :  { %276 = dma.vmem_to_hbm [thread:$0]  %s274_s19, 128, %s439_s7, [#allocation3]  }
 0x234   :  { %344 = dma.done.wait [#allocation3], 128  }
 0x235   :  { %345 = vsyncadd [#allocation3], 4294967168 }
 0x236   :  { %280 = vsyncpa [#allocation3], 1 }

</bundles_post_ra>
